<compile_context>
chip_gen: v5e
topology: v5e:2x2
jax: 0.10.0
libtpu: 0.0.40
codegen_flags: <defaults>
</compile_context>

<pallas_src>
import jax
import jax.numpy as jnp
from jax.experimental import pallas as pl
from jax.experimental.pallas import tpu as pltpu


def _round_up(x: int, m: int) -> int:
    return (x + m - 1) // m * m


def _cdiv(a: int, b: int) -> int:
    return -(-a // b)


def _vmem_capacity_bytes() -> int:
    try:
        info = pltpu.get_tpu_info()
        cap = getattr(info, "vmem_capacity_bytes", None)
        if cap:
            return int(cap)
    except Exception:
        pass
    return 64 * 1024 * 1024  # conservative default (v7x per-TC VMEM)


# ---------------------------------------------------------------------------
# Kernels
# ---------------------------------------------------------------------------
def _tree_root_kernel_1d(x_ref, w_ref, b_ref, o_ref):
    # x_ref: (TB, N, U) native dtype; w_ref: (U, U) = W.T / N; b_ref: (1, U)
    # o_ref: (TB, U) f32
    pooled = jnp.sum(x_ref[...].astype(jnp.float32), axis=1)  # SUM; 1/N folded into W
    y = jnp.dot(pooled.astype(w_ref.dtype), w_ref[...],
                preferred_element_type=jnp.float32) + b_ref[...]
    o_ref[...] = jnp.maximum(y, 0.0).astype(o_ref.dtype)


def _tree_root_kernel_2d(x_ref, w_ref, b_ref, o_ref):
    # Reduction over node chunks (grid axis 1).  The output block's index is
    # constant along k, so it stays VMEM-resident and doubles as the f32
    # accumulator (no scratch buffer needed).
    k = pl.program_id(1)

    @pl.when(k == 0)
    def _():
        o_ref[...] = jnp.zeros_like(o_ref)

    o_ref[...] += jnp.sum(x_ref[...].astype(jnp.float32), axis=1)

    @pl.when(k == pl.num_programs(1) - 1)
    def _():
        pooled = o_ref[...]
        y = jnp.dot(pooled.astype(w_ref.dtype), w_ref[...],
                    preferred_element_type=jnp.float32) + b_ref[...]
        o_ref[...] = jnp.maximum(y, 0.0).astype(o_ref.dtype)


# ---------------------------------------------------------------------------
# Wrapper
# ---------------------------------------------------------------------------
def tree_root_forward(tree_list, weight, bias, *, use_bf16_matmul: bool = False,
                      x_block_bytes: int | None = None):
    """tree_list: (B, N, U) any float dtype; weight: (U, U) PyTorch [out, in];
    bias: (U,).  Returns (B, U) f32 == ReLU(mean_over_N(tree_list) @ W.T + b)."""
    B, N, U = tree_list.shape
    itemsize = jnp.dtype(tree_list.dtype).itemsize

    # ---- generation-dependent budgets --------------------------------------
    vmem_cap = _vmem_capacity_bytes()
    vmem_limit = int(min(max(vmem_cap * 3 // 4, 32 * 1024 * 1024), 100 * 1024 * 1024))
    if x_block_bytes is None:
        # ~12.8 MiB blocks on 128 MiB chips (v5e/v6e), ~6.4 MiB on v7x.
        x_block_bytes = max(vmem_cap // 10, 1 * 1024 * 1024)

    # ---- tiny params: pre-transpose W and fold in the 1/N mean -------------
    w = weight.astype(jnp.float32).T / jnp.float32(N)       # (U_in, U_out)
    b = bias.astype(jnp.float32).reshape(1, U)
    # Keep the VMEM-resident weight block small (and MXU-friendly on v5e):
    # bf16 storage when requested or when an f32 copy would eat real VMEM.
    if use_bf16_matmul or (U * U * 4 * 2 > vmem_limit // 4):
        w = w.astype(jnp.bfloat16)
    # TODO(synk): for very large U where even a bf16 (U, U) weight no longer
    # fits VMEM, tile the weight's output-column dimension with a 3rd grid axis.

    out_shape = jax.ShapeDtypeStruct((B, U), jnp.float32)
    row_bytes = max(N * U * itemsize, 1)          # bytes of one full-node batch row
    tb_min = B if B <= 8 else 8
    tb_full = x_block_bytes // row_bytes          # batch rows whose full node slab fits

    if tb_full >= tb_min:
        # ---- common case: full node axis in one block -> 1-D grid ----------
        TB = min(B, tb_full, 512)
        if B >= 16:
            # >= 2 parallel grid steps so both v7x TensorCores get work.
            TB = min(TB, _round_up(_cdiv(B, 2), 8))
        if TB < B:
            TB = max(8, TB // 8 * 8)              # tiled batch blocks: sublane aligned
        grid_b = _cdiv(B, TB)

        return pl.pallas_call(
            _tree_root_kernel_1d,
            out_shape=out_shape,
            grid=(grid_b,),
            in_specs=[
                pl.BlockSpec((TB, N, U), lambda i: (i, 0, 0)),
                pl.BlockSpec(w.shape, lambda i: (0, 0)),      # VMEM-resident
                pl.BlockSpec((1, U), lambda i: (0, 0)),       # VMEM-resident
            ],
            out_specs=pl.BlockSpec((TB, U), lambda i: (i, 0)),
            compiler_params=pltpu.CompilerParams(
                dimension_semantics=("parallel",),
                vmem_limit_bytes=vmem_limit,
            ),
        )(tree_list, w, b)

    # ---- large-N fallback: 2-D grid, accumulate into the output block ------
    TB = tb_min
    tn_cap = max(8, (x_block_bytes // max(TB * U * itemsize, 1)) // 8 * 8)
    tn_cap = min(tn_cap, _round_up(N, 8))

    # Prefer a multiple-of-8 node-chunk size that divides N exactly (no pad copy).
    TN = 0
    t = tn_cap
    while t >= 8:
        if N % t == 0:
            TN = t
            break
        t -= 8

    x = tree_list
    if TN == 0:
        # Rare fallback: zero-pad the node axis once (padded nodes add 0 to the
        # sum; the 1/N scale is already folded into W, so this is exact).
        TN = tn_cap
        n_pad = _round_up(N, TN)
        x = jnp.zeros((B, n_pad, U), tree_list.dtype).at[:, :N, :].set(tree_list)

    grid_b = _cdiv(B, TB)
    grid_n = x.shape[1] // TN

    return pl.pallas_call(
        _tree_root_kernel_2d,
        out_shape=out_shape,
        grid=(grid_b, grid_n),
        in_specs=[
            pl.BlockSpec((TB, TN, U), lambda i, k: (i, k, 0)),
            pl.BlockSpec(w.shape, lambda i, k: (0, 0)),       # VMEM-resident
            pl.BlockSpec((1, U), lambda i, k: (0, 0)),        # VMEM-resident
        ],
        out_specs=pl.BlockSpec((TB, U), lambda i, k: (i, 0)),
        compiler_params=pltpu.CompilerParams(
            dimension_semantics=("parallel", "arbitrary"),
            vmem_limit_bytes=vmem_limit,
        ),
    )(x, w, b)


# ---------------------------------------------------------------------------
# Reference + demo
# ---------------------------------------------------------------------------
def reference_forward(tree_list, weight, bias):
    pooled = jnp.mean(tree_list.astype(jnp.float32), axis=1)  # adaptive avg pool
    y = pooled @ weight.astype(jnp.float32).T + bias.astype(jnp.float32)
    return jnp.maximum(y, 0.0)


if __name__ == "__main__":
    key = jax.random.PRNGKey(0)
    k_x, k_w, k_b, k_x2 = jax.random.split(key, 4)

    # ---- demo shapes (small) ------------------------------------------------
    num_units = 32   # U
    batch = 2        # B
    num_nodes = 8    # N (tree nodes pooled away)

    tree_list = jax.random.normal(k_x, (batch, num_nodes, num_units), dtype=jnp.float32)
    weight = jax.random.normal(k_w, (num_units, num_units), dtype=jnp.float32) * 0.1
    bias = jax.random.normal(k_b, (num_units,), dtype=jnp.float32) * 0.1

    out = jax.block_until_ready(tree_root_forward(tree_list, weight, bias))
    ref = reference_forward(tree_list, weight, bias)
    assert out.shape == (batch, num_units)
    assert jnp.allclose(out, ref, atol=1e-5, rtol=1e-5), "mismatch vs reference (1-D path)"

    # ---- also exercise the chunked (2-D grid) reduction path ----------------
    tl2 = jax.random.normal(k_x2, (16, 64, num_units), dtype=jnp.float32)
    out2 = jax.block_until_ready(
        tree_root_forward(tl2, weight, bias, x_block_bytes=16 * 1024))  # forces node chunking
    ref2 = reference_forward(tl2, weight, bias)
    assert out2.shape == (16, num_units)
    assert jnp.allclose(out2, ref2, atol=1e-5, rtol=1e-5), "mismatch vs reference (2-D path)"

    print("KERNEL_OK")
</pallas_src>

<mosaic_0001>
module attributes {stable_mosaic.version = 11 : i64} {
  func.func @_tree_root_kernel_1d(%arg0: i32, %arg1: memref<2x8x32xf32, #tpu.memory_space<vmem>>, %arg2: memref<32x32xf32, #tpu.memory_space<vmem>>, %arg3: memref<1x32xf32, #tpu.memory_space<vmem>>, %arg4: memref<2x32xf32, #tpu.memory_space<vmem>>) attributes {dimension_semantics = [#tpu.dimension_semantics<parallel>], iteration_bounds = array<i64: 1>, scalar_prefetch = 0 : i64, scratch_operands = 0 : i64, tpu.core_type = #tpu.core_type<tc>, window_params = [{transform_indices = @transform_0, window_bounds = array<i64: 2, 8, 32>}, {pipeline_mode = #tpu.pipeline_mode<synchronous>, transform_indices = @transform_1, window_bounds = array<i64: 32, 32>}, {pipeline_mode = #tpu.pipeline_mode<synchronous>, transform_indices = @transform_2, window_bounds = array<i64: 1, 32>}, {transform_indices = @transform_3, window_bounds = array<i64: 2, 32>}]} {
    %c0 = arith.constant 0 : index
    %c0_0 = arith.constant 0 : index
    %c0_1 = arith.constant 0 : index
    %0 = vector.load %arg1[%c0, %c0_0, %c0_1] : memref<2x8x32xf32, #tpu.memory_space<vmem>>, vector<2x8x32xf32>
    %cst = arith.constant dense<0.000000e+00> : vector<2x32xf32>
    %1 = vector.multi_reduction <add>, %0, %cst [1] : vector<2x8x32xf32> to vector<2x32xf32>
    %c0_2 = arith.constant 0 : index
    %c0_3 = arith.constant 0 : index
    %2 = vector.load %arg2[%c0_2, %c0_3] : memref<32x32xf32, #tpu.memory_space<vmem>>, vector<32x32xf32>
    %cst_4 = arith.constant dense<0.000000e+00> : vector<2x32xf32>
    %3 = tpu.matmul %1, %2, %cst_4 {dimension_numbers = #tpu.dot_dimension_numbers<[1], [0], [0], [1], [0, 0, 1, 1], [], []>} : vector<2x32xf32>, vector<32x32xf32>, vector<2x32xf32> -> vector<2x32xf32>
    %c0_5 = arith.constant 0 : index
    %c0_6 = arith.constant 0 : index
    %4 = vector.load %arg3[%c0_5, %c0_6] : memref<1x32xf32, #tpu.memory_space<vmem>>, vector<1x32xf32>
    %5 = vector.broadcast %4 : vector<1x32xf32> to vector<2x32xf32>
    %6 = arith.addf %3, %5 : vector<2x32xf32>
    %cst_7 = arith.constant 0.000000e+00 : f32
    %7 = vector.broadcast %cst_7 : f32 to vector<2x32xf32>
    %8 = arith.maximumf %6, %7 : vector<2x32xf32>
    %c0_8 = arith.constant 0 : index
    %c0_9 = arith.constant 0 : index
    %9 = vector.load %arg4[%c0_8, %c0_9] : memref<2x32xf32, #tpu.memory_space<vmem>>, vector<2x32xf32>
    tpu.vector_store %arg4[%c0_8, %c0_9], %8 {strides = array<i32>} : memref<2x32xf32, #tpu.memory_space<vmem>>, vector<2x32xf32>,
    return
  }
  func.func @transform_0(%arg0: i32) -> (i32, i32, i32) {
    %c0_i32 = arith.constant 0 : i32
    %c0_i32_0 = arith.constant 0 : i32
    %c0_i32_1 = arith.constant 0 : i32
    return %arg0, %c0_i32, %c0_i32_0 : i32, i32, i32
  }
  func.func @transform_1(%arg0: i32) -> (i32, i32) {
    %c0_i32 = arith.constant 0 : i32
    %c0_i32_0 = arith.constant 0 : i32
    %c0_i32_1 = arith.constant 0 : i32
    return %c0_i32, %c0_i32_0 : i32, i32
  }
  func.func @transform_2(%arg0: i32) -> (i32, i32) {
    %c0_i32 = arith.constant 0 : i32
    %c0_i32_0 = arith.constant 0 : i32
    %c0_i32_1 = arith.constant 0 : i32
    return %c0_i32, %c0_i32_0 : i32, i32
  }
  func.func @transform_3(%arg0: i32) -> (i32, i32) {
    %c0_i32 = arith.constant 0 : i32
    %c0_i32_0 = arith.constant 0 : i32
    return %arg0, %c0_i32 : i32, i32
  }
}

</mosaic_0001>

<bundles_post_ra>
// kernel: tpu_custom_call.1
= control target key start
LH: loop header
LB: loop body
LE: loop exit
PB: predicated region body
PF: predicated region fallthrough
CT: control target
= control target key end

     0   :  { %8 = vsyncpa [#allocation3], 0  ;;  %s244_s0 = inlined_call_operand.hbm [shape: f32[2,8,32], index: 0, kind: input, shape index: {}]   ;;  %s245_s1 = inlined_call_operand.hbm [shape: f32[32,32], index: 1, kind: input, shape index: {}]   ;;  %s246_s2 = inlined_call_operand.vmem [shape: f32[1,32], index: 2, kind: input, shape index: {}]   ;;  %s247_s3 = inlined_call_operand.hbm [shape: f32[2,32], index: 3, kind: output, shape index: {}]  }
   0x1   :  { %9 = vsyncpa [#allocation6], 0 }
   0x2   :  { %10 = vsyncpa [#allocation4], 0  ;;  %s15_s14 = sshll.u32 %s244_s0, 4  ;;  %s204_s15 = smov [#allocation2]   ;;  %s16_s14 = int_to_ptr.hbm [resolvable:$true] %s15_s14 }
   0x3   :  { %s17_s16 = sshll.u32 %s204_s15, 4  ;;  %s28_s19 = sshll.u32 %s245_s1, 4  ;;  %s18_s16 = int_to_ptr.vmem [resolvable:$true] %s17_s16  ;;  %s29_s19 = int_to_ptr.hbm [resolvable:$true] %s28_s19 }
   0x4   :  { %s205_s20 = smov 128   ;;  %s206_s21 = smov 8  }
   0x5   :  { %23 = dma.hbm_to_vmem [thread:$0]  %s16_s14, 256, %s18_s16, [#allocation3], %s205_s20, %s205_s20, %s206_s21  }
   0x6   :  { %s207_s22 = smov [#allocation5]  }
   0x7   :  { %s30_s23 = sshll.u32 %s207_s22, 4  ;;  %s31_s23 = int_to_ptr.vmem [resolvable:$true] %s30_s23 }
   0x8   :  { %36 = dma.hbm_to_vmem [thread:$0]  %s29_s19, 512, %s31_s23, [#allocation6], %s205_s20, %s205_s20, %s206_s21  }
   0x9   :  { %198 = dma.done.wait [#allocation3], 256  }
   0xa   :  { %199 = vsyncadd [#allocation3], 4294967040 }
   0xb   :  { %200 = dma.done.wait [#allocation6], 512  }
   0xc   :  { %201 = vsyncadd [#allocation6], 4294966784  ;;  %vm49_vm0 = vcmask 261120   ;;  %v67_v0 = vld [vmem:[#allocation5 + $0x18] sm:$0xff]  ;;  %v66_v1 = vld [vmem:[#allocation5 + $0x10] sm:$0xff]  ;;  %vm74_vm1 = vcmask 1041409  }
   0xd   :  { %90 = vmatpush.msra.mxu0 %v67_v0  ;;  %v47_v2 = vld [vmem:[#allocation2] sm:$0xff]  ;;  %v48_v3 = vld [vmem:[#allocation2 + $0x8] sm:$0xff]  ;;  %v65_v4 = vld [vmem:[#allocation5 + $0x8] sm:$0xff]  ;;  %s208_s24 = smov [#allocation7]   ;;  %s108_s28 = sshll.u32 %s247_s3, 4  ;;  %vm99_vm2 = vcmask 254976   ;;  %s109_s28 = int_to_ptr.hbm [resolvable:$true] %s108_s28 }
   0xe   :  { %v50_v5 = vsel %vm49_vm0, %v47_v2, 0.0  ;;  %v57_v6 = vsel %vm49_vm0, %v48_v3, 0.0  ;;  %v64_v9 = vld [vmem:[#allocation5] sm:$0xff]  ;;  %v125_v21 = vld [vmem:[%s246_s2] ss:$0 sm:$0xff]  ;;  %s106_s25 = sshll.u32 %s208_s24, 4  ;;  %s107_s25 = int_to_ptr.vmem [resolvable:$true] %s106_s25 }
   0xf   :  { %91 = vmatpush.msra.mxu0 %v66_v1  ;;  %v51_v7 = vrot.slane %v50_v5, 4  ;;  %v58_v8 = vrot.slane %v57_v6, 4 }
  0x11   :  { %92 = vmatpush.msra.mxu0 %v65_v4  ;;  %v52_v10 = vadd.f32 %v51_v7, %v50_v5  ;;  %v59_v11 = vadd.f32 %v58_v8, %v57_v6 }
  0x13   :  { %93 = vmatpush.msra.mxu0 %v64_v9  ;;  %v53_v12 = vrot.slane %v52_v10, 2  ;;  %v60_v13 = vrot.slane %v59_v11, 2 }
  0x15   :  { %v54_v14 = vadd.f32 %v53_v12, %v52_v10  ;;  %v61_v15 = vadd.f32 %v60_v13, %v59_v11 }
  0x17   :  { %v55_v16 = vrot.slane %v54_v14, 1  ;;  %v62_v17 = vrot.slane %v61_v15, 1 }
  0x19   :  { %v56_v18 = vadd.f32 %v55_v16, %v54_v14  ;;  %v63_v19 = vadd.f32 %v62_v17, %v61_v15 }
  0x1b   :  { %v75_v20 = vsel %vm74_vm1, %v63_v19, %v56_v18 }
  0x1c   :  { %119 = vmatmul.msk.f32.vlgmr.msra.gmra.mxu0 %vm49_vm0, %v75_v20 }
  0x99   :  { %v95_v22 = vpop.f32.mrf.mxu0 }
  0x9a   :  { %v96_v23 = vadd.f32 %v125_v21, %v95_v22 }
  0x9c   :  { %v98_v24 = vmax.f32 %v96_v23, 0.0 }
  0x9e   :  { %100 = vst.msk [vmem:[#allocation7] sm:$0x3] %vm99_vm2, %v98_v24 }
  0x9f   :  { %111 = dma.vmem_to_hbm [thread:$0]  %s107_s25, 32, %s109_s28, [#allocation4]  }
  0xa0   :  { %202 = dma.done.wait [#allocation4], 32  }
  0xa1   :  { %203 = vsyncadd [#allocation4], 4294967264 }
  0xa2   :  { %116 = vsyncpa [#allocation3], 1 }
  0xa3   :  { %117 = vsyncpa [#allocation6], 1 }
  0xa4   :  { %118 = vsyncpa [#allocation4], 1 }

</bundles_post_ra>
